<compile_context>
chip_gen: v7x
topology: tpu7x:2x2x1
jax: 0.10.0
libtpu: 0.0.40
codegen_flags: <defaults>
</compile_context>

<pallas_src>
import functools

import numpy as np

import jax
import jax.numpy as jnp
from jax import lax
from jax.experimental import pallas as pl
from jax.experimental.pallas import tpu as pltpu


def _activation(x):
    # Deterministic choice for the module's `activation` constructor arg: ReLU.
    return jnp.maximum(x, 0)


def _round_up(x, m):
    return -(-x // m) * m


def _cdiv(a, b):
    return -(-a // b)


def _largest_divisor_leq(n, cap):
    cap = max(1, min(n, cap))
    for d in range(cap, 0, -1):
        if n % d == 0:
            return d
    return 1


def _tpu_config():
    """Best-effort hardware introspection: (physical VMEM bytes, #TC, is_v7x)."""
    kind = ""
    try:
        kind = jax.devices()[0].device_kind.lower()
    except Exception:
        pass
    is_v7 = "v7" in kind
    vmem_phys = None
    try:
        info = pltpu.get_tpu_info()
        vmem_phys = int(getattr(info, "vmem_capacity_bytes", 0)) or None
    except Exception:
        vmem_phys = None
    if vmem_phys is None:
        # v5e / v6e are 128 MiB parts; default conservatively to 64 MiB (v7x).
        vmem_phys = 128 * 1024 * 1024 if ("v5" in kind or "v6" in kind) else 64 * 1024 * 1024
    num_tc = 2 if is_v7 else 1
    return vmem_phys, num_tc, is_v7


def _linear_attention_kernel(q_ref, k_ref, v_ref, o_ref, mat_acc, norm_acc, *,
                             n_items, item_tile, ragged, low_precision, q_chunk):
    """Grid = (batch_blocks, item_blocks).  Per-block shapes:

      q_ref    : (Bblk, Nq, A)   resident across the item (reduction) axis
      k_ref    : (Bblk, Tk, A)
      v_ref    : (Bblk, Tk, M)
      o_ref    : (Bblk, Nq, M)   written only on the last item step
      mat_acc  : (Bblk, A, M)    f32 VMEM accumulator  (= relu(key)^T @ value)
      norm_acc : (Bblk, 1, A)    f32 VMEM accumulator  (= sum_items relu(key))
    """
    ki = pl.program_id(1)

    @pl.when(ki == 0)
    def _init():
        mat_acc[...] = jnp.zeros_like(mat_acc)
        norm_acc[...] = jnp.zeros_like(norm_acc)

    # --- accumulate the attention kernel over this item tile -----------------
    k = _activation(k_ref[...])                          # (Bblk, Tk, A), native dtype
    v = v_ref[...]                                       # (Bblk, Tk, M), native dtype

    if ragged:
        # Boundary tile on the item axis: rows past the true item count hold
        # unspecified buffer contents.  Zero them in BOTH operands before they
        # reach the matmul or the normalizer sum (otherwise the denominator is
        # inflated / garbage propagates).
        base = ki * item_tile
        row_k = lax.broadcasted_iota(jnp.int32, (1,) + k.shape[1:], 1)
        row_v = lax.broadcasted_iota(jnp.int32, (1,) + v.shape[1:], 1)
        k = jnp.where(base + row_k < n_items, k, 0)
        v = jnp.where(base + row_v < n_items, v, 0)

    # Operands stay in their native dtype (bf16 feeds the MXU directly); the
    # accumulation is f32 via preferred_element_type.  key is intentionally NOT
    # pre-transposed in the wrapper: that would cost a full HBM re-read/re-write
    # of key, and any in-kernel transpose is hidden under the k/v DMA.
    mat_acc[...] += lax.dot_general(                     # relu(k)^T @ v -> (Bblk, A, M)
        k, v,
        dimension_numbers=(((1,), (1,)), ((0,), (0,))),
        preferred_element_type=jnp.float32)
    # Fused f32-accumulating reduction: no materialized f32 copy of the k tile.
    norm_acc[...] += jnp.sum(k, axis=1, keepdims=True, dtype=jnp.float32)

    # --- finalize: out = relu(q) @ matrix / (relu(q) . normalizer + eps) -----
    @pl.when(ki == pl.num_programs(1) - 1)
    def _finalize():
        mat = mat_acc[...]                               # (Bblk, A, M) f32
        if low_precision:
            # bf16 inputs: keep the finalize matmul on the bf16 MXU path
            # (f32xf32 dots lower through multiple bf16 passes on v5e/v6e).
            mat = mat.astype(q_ref.dtype)
        norm = norm_acc[...]                             # (Bblk, 1, A) f32

        def emit(q_start, q_rows):
            q = _activation(q_ref[:, pl.ds(q_start, q_rows), :])
            if not low_precision:
                q = q.astype(jnp.float32)
            numerator = lax.dot_general(                 # (Bblk, q_rows, M), f32
                q, mat,
                dimension_numbers=(((2,), (1,)), ((0,), (0,))),
                preferred_element_type=jnp.float32)
            denominator = jnp.sum(q * norm, axis=-1, keepdims=True) + 1e-5  # f32
            inv = pl.reciprocal(denominator, approx=True)   # EUP slot, ~free
            o_ref[:, pl.ds(q_start, q_rows), :] = (numerator * inv).astype(o_ref.dtype)

        n_q = q_ref.shape[1]
        if n_q > q_chunk and n_q % q_chunk == 0:
            # Bound f32 q / numerator live ranges for large query counts.
            def body(c, carry):
                emit(pl.multiple_of(c * q_chunk, q_chunk), q_chunk)
                return carry
            lax.fori_loop(0, n_q // q_chunk, body, 0, unroll=True)
        else:
            emit(0, n_q)


def linear_attention(query, key, value, *, max_item_tile=None):
    """query (..., Nq, A), key (..., Nk, A), value (..., Nk, M) -> (..., Nq, M)."""
    *lead, n_q, d_addr = query.shape
    *lead_k, n_items, d_addr_k = key.shape
    *lead_v, n_items_v, d_mem = value.shape
    assert tuple(lead) == tuple(lead_k) == tuple(lead_v)
    assert d_addr == d_addr_k and n_items == n_items_v

    batch = int(np.prod(lead)) if lead else 1
    q3 = query.reshape(batch, n_q, d_addr)
    k3 = key.reshape(batch, n_items, d_addr)
    v3 = value.reshape(batch, n_items, d_mem)
    if k3.dtype != v3.dtype:   # rare mixed-dtype corner: unify for the MXU dot
        common = jnp.result_type(k3.dtype, v3.dtype)
        k3, v3 = k3.astype(common), v3.astype(common)

    out_dtype = query.dtype
    low_precision = (q3.dtype == jnp.bfloat16 and k3.dtype == jnp.bfloat16)

    # --- generation-aware VMEM / tile budget ----------------------------------
    vmem_phys, num_tc, is_v7 = _tpu_config()
    if vmem_phys >= 128 * 1024 * 1024:
        vmem_limit = 100 * 1024 * 1024        # v5e / v6e: use most of the 128 MiB part
    elif vmem_phys >= 64 * 1024 * 1024:
        vmem_limit = 48 * 1024 * 1024         # v7x: leave headroom below 64 MiB physical
    else:
        vmem_limit = (vmem_phys * 3) // 4
    budget = (vmem_limit * 7) // 10           # headroom for compiler-internal scratch

    kv_buffers = 3 if is_v7 else 2            # deeper k/v pipelining on v7x only

    q_isz = jnp.dtype(q3.dtype).itemsize
    k_isz = jnp.dtype(k3.dtype).itemsize
    v_isz = jnp.dtype(v3.dtype).itemsize
    o_isz = jnp.dtype(out_dtype).itemsize

    lane = lambda d: _round_up(d, 128)        # Mosaic pads last dim to 128 lanes
    sub = lambda d: _round_up(d, 8)           # and 2nd-to-last dim to 8 sublanes

    # Per-batch-element VMEM footprints.
    acc_pb = (sub(d_addr) * lane(d_mem) + 8 * lane(d_addr)) * 4           # f32 accumulators
    fixed_pb = (acc_pb
                + 2 * sub(n_q) * lane(d_addr) * q_isz                     # q block (2 bufs)
                + 2 * sub(n_q) * lane(d_mem) * o_isz)                     # out block (2 bufs)
    kv_row_pb = kv_buffers * (lane(d_addr) * k_isz + lane(d_mem) * v_isz)  # VMEM / item row
    kv_row_stream = d_addr * k_isz + d_mem * v_isz                         # HBM bytes / item row

    # --- batch packing: Bblk must divide batch (no padding anywhere) ----------
    tk_probe = min(_round_up(n_items, 8), 64)
    bcap = max(1, budget // max(1, fixed_pb + tk_probe * kv_row_pb))
    bcap = min(bcap, batch)
    if num_tc > 1 and batch > 1:
        # Only on dual-TensorCore parts: keep >=2 "parallel" batch grid steps.
        bcap = min(bcap, max(1, batch // 2))
    b_blk = _largest_divisor_leq(batch, bcap)

    # --- item tile: as large as the VMEM budget allows, ~<=8 MiB streamed/step -
    n_items8 = _round_up(n_items, 8)
    tk_vmem = (budget // b_blk - fixed_pb) // max(1, kv_row_pb)
    tk_stream = (8 << 20) // max(1, b_blk * kv_row_stream)
    item_tile = min(n_items8, max(8, tk_vmem), max(1024, tk_stream))
    if max_item_tile is not None:
        item_tile = min(item_tile, max(8, int(max_item_tile)))
    item_tile = max(8, (item_tile // 8) * 8)

    if item_tile >= n_items:
        item_tile = n_items                   # single full-extent item block, no masking
        grid_k = 1
    else:
        grid_k = _cdiv(n_items, item_tile)
        item_tile = _round_up(_cdiv(n_items, grid_k), 8)   # rebalance the last tile
        grid_k = _cdiv(n_items, item_tile)
    ragged = (n_items % item_tile) != 0

    grid = (batch // b_blk, grid_k)

    kernel = functools.partial(
        _linear_attention_kernel,
        n_items=n_items, item_tile=item_tile, ragged=ragged,
        low_precision=low_precision, q_chunk=256)

    def _kv_spec(shape, index_map):
        if kv_buffers != 2:
            try:
                return pl.BlockSpec(shape, index_map,
                                    pipeline_mode=pl.Buffered(kv_buffers))
            except (TypeError, AttributeError):
                pass
        return pl.BlockSpec(shape, index_map)

    # Note: when d_mem < 128 the output stores are lane-masked; padding it
    # lane-dense would require a full HBM copy of `value`, a net loss for this
    # memory-bound kernel, so we accept the masked stores.
    in_specs = [
        # q / out resident across the item (reduction) axis.
        pl.BlockSpec((b_blk, n_q, d_addr), lambda b, k: (b, 0, 0)),
        _kv_spec((b_blk, item_tile, d_addr), lambda b, k: (b, k, 0)),
        _kv_spec((b_blk, item_tile, d_mem), lambda b, k: (b, k, 0)),
    ]
    out_spec = pl.BlockSpec((b_blk, n_q, d_mem), lambda b, k: (b, 0, 0))

    # TODO(synk): when batch==1 on dual-TC parts (v7x), split the item axis
    # across the two TensorCores into partial (A, M) accumulators + a cheap
    # combine so the second core isn't idle.
    # TODO(synk): extremely large Nq*A (q block not fitting VMEM) would need an
    # Nq grid axis or a manual q DMA; not needed for this module's typical sizes.
    out = pl.pallas_call(
        kernel,
        out_shape=jax.ShapeDtypeStruct((batch, n_q, d_mem), out_dtype),
        grid_spec=pltpu.PrefetchScalarGridSpec(
            num_scalar_prefetch=0,
            grid=grid,
            in_specs=in_specs,
            out_specs=out_spec,
            scratch_shapes=[
                pltpu.VMEM((b_blk, d_addr, d_mem), jnp.float32),   # relu(k)^T @ v
                pltpu.VMEM((b_blk, 1, d_addr), jnp.float32),       # sum_items relu(k)
            ],
        ),
        compiler_params=pltpu.CompilerParams(
            dimension_semantics=("parallel", "arbitrary"),
            vmem_limit_bytes=vmem_limit),
    )(q3, k3, v3)

    return out.reshape(*lead, n_q, d_mem) if lead else out.reshape(n_q, d_mem)


def linear_attention_ref(query, key, value):
    """Plain-JAX reference mirroring the PyTorch forward (f32, high precision)."""
    q = jnp.maximum(query.astype(jnp.float32), 0.0)
    k = jnp.maximum(key.astype(jnp.float32), 0.0)
    v = value.astype(jnp.float32)
    matrix = jnp.einsum("...ia,...im->...am", k, v, precision=lax.Precision.HIGHEST)
    normalizer = jnp.sum(k, axis=-2)                                    # (..., A)
    numerator = jnp.einsum("...qa,...am->...qm", q, matrix,
                           precision=lax.Precision.HIGHEST)
    denominator = jnp.sum(q * normalizer[..., None, :], axis=-1,
                          keepdims=True) + 1e-5
    return numerator / denominator


if __name__ == "__main__":
    # Case 1: small aligned shapes, float32.
    B, Nq, Nk, A, M = 2, 8, 8, 32, 32
    kq, kk, kv = jax.random.split(jax.random.PRNGKey(0), 3)
    query = jax.random.normal(kq, (B, Nq, A), dtype=jnp.float32)
    key = jax.random.normal(kk, (B, Nk, A), dtype=jnp.float32)
    value = jax.random.normal(kv, (B, Nk, M), dtype=jnp.float32)
    out = jax.block_until_ready(linear_attention(query, key, value))
    ref = linear_attention_ref(query, key, value)
    # f32 matmuls may legitimately lower through bf16 MXU passes -> loose tolerance.
    np.testing.assert_allclose(np.asarray(out), np.asarray(ref), rtol=2e-2, atol=2e-2)

    # Case 2: bfloat16 path (bf16 MXU matmuls end-to-end, f32 accumulation).
    q16, k16, v16 = (x.astype(jnp.bfloat16) for x in (query, key, value))
    out16 = jax.block_until_ready(linear_attention(q16, k16, v16))
    ref16 = linear_attention_ref(q16, k16, v16)
    np.testing.assert_allclose(np.asarray(out16.astype(jnp.float32)),
                               np.asarray(ref16), rtol=5e-2, atol=5e-2)

    # Case 3: awkward shapes, exercising the no-padding path: ragged item axis
    # (masked boundary tile), Nq not a multiple of 8, A/M not multiples of 128,
    # odd batch.  max_item_tile forces multiple item-grid steps at small Nk.
    B, Nq, Nk, A, M = 3, 5, 20, 48, 40
    kq, kk, kv = jax.random.split(jax.random.PRNGKey(1), 3)
    query = jax.random.normal(kq, (B, Nq, A), dtype=jnp.float32)
    key = jax.random.normal(kk, (B, Nk, A), dtype=jnp.float32)
    value = jax.random.normal(kv, (B, Nk, M), dtype=jnp.float32)
    out = jax.block_until_ready(linear_attention(query, key, value, max_item_tile=8))
    ref = linear_attention_ref(query, key, value)
    np.testing.assert_allclose(np.asarray(out), np.asarray(ref), rtol=2e-2, atol=2e-2)

    print("KERNEL_OK")
</pallas_src>

<mosaic_0001>
module attributes {stable_mosaic.version = 11 : i64} {
  func.func @_linear_attention_kernel(%arg0: i32, %arg1: i32, %arg2: memref<2x8x32xf32, #tpu.memory_space<vmem>>, %arg3: memref<2x8x32xf32, #tpu.memory_space<vmem>>, %arg4: memref<2x8x32xf32, #tpu.memory_space<vmem>>, %arg5: memref<2x8x32xf32, #tpu.memory_space<vmem>>, %arg6: memref<2x32x32xf32, #tpu.memory_space<vmem>>, %arg7: memref<2x1x32xf32, #tpu.memory_space<vmem>>) attributes {dimension_semantics = [#tpu.dimension_semantics<parallel>, #tpu.dimension_semantics<arbitrary>], iteration_bounds = array<i64: 1, 1>, scalar_prefetch = 0 : i64, scratch_operands = 2 : i64, tpu.core_type = #tpu.core_type<tc>, window_params = [{transform_indices = @transform_0, window_bounds = array<i64: 2, 8, 32>}, {transform_indices = @transform_1, window_bounds = array<i64: 2, 8, 32>}, {transform_indices = @transform_2, window_bounds = array<i64: 2, 8, 32>}, {transform_indices = @transform_3, window_bounds = array<i64: 2, 8, 32>}]} {
    %c0_i32 = arith.constant 0 : i32
    %0 = arith.cmpi eq, %arg1, %c0_i32 : i32
    %1 = arith.extui %0 : i1 to i32
    %c0_i32_0 = arith.constant 0 : i32
    %2 = arith.cmpi ne, %1, %c0_i32_0 : i32
    scf.if %2 {
      %cst_22 = arith.constant 0.000000e+00 : f32
      %19 = vector.broadcast %cst_22 : f32 to vector<2x32x32xf32>
      %c0_23 = arith.constant 0 : index
      %c0_24 = arith.constant 0 : index
      %c0_25 = arith.constant 0 : index
      %20 = vector.load %arg6[%c0_23, %c0_24, %c0_25] : memref<2x32x32xf32, #tpu.memory_space<vmem>>, vector<2x32x32xf32>
      tpu.vector_store %arg6[%c0_23, %c0_24, %c0_25], %19 {strides = array<i32>} : memref<2x32x32xf32, #tpu.memory_space<vmem>>, vector<2x32x32xf32>,
      %cst_26 = arith.constant 0.000000e+00 : f32
      %21 = vector.broadcast %cst_26 : f32 to vector<2x1x32xf32>
      %c0_27 = arith.constant 0 : index
      %c0_28 = arith.constant 0 : index
      %c0_29 = arith.constant 0 : index
      %22 = vector.load %arg7[%c0_27, %c0_28, %c0_29] : memref<2x1x32xf32, #tpu.memory_space<vmem>>, vector<2x1x32xf32>
      tpu.vector_store %arg7[%c0_27, %c0_28, %c0_29], %21 {strides = array<i32>} : memref<2x1x32xf32, #tpu.memory_space<vmem>>, vector<2x1x32xf32>,
    } else {
    }
    %c0 = arith.constant 0 : index
    %c0_1 = arith.constant 0 : index
    %c0_2 = arith.constant 0 : index
    %3 = vector.load %arg3[%c0, %c0_1, %c0_2] : memref<2x8x32xf32, #tpu.memory_space<vmem>>, vector<2x8x32xf32>
    %cst = arith.constant 0.000000e+00 : f32
    %4 = vector.broadcast %cst : f32 to vector<2x8x32xf32>
    %5 = arith.maximumf %3, %4 : vector<2x8x32xf32>
    %c0_3 = arith.constant 0 : index
    %c0_4 = arith.constant 0 : index
    %c0_5 = arith.constant 0 : index
    %6 = vector.load %arg4[%c0_3, %c0_4, %c0_5] : memref<2x8x32xf32, #tpu.memory_space<vmem>>, vector<2x8x32xf32>
    %c0_6 = arith.constant 0 : index
    %c0_7 = arith.constant 0 : index
    %c0_8 = arith.constant 0 : index
    %7 = vector.load %arg6[%c0_6, %c0_7, %c0_8] : memref<2x32x32xf32, #tpu.memory_space<vmem>>, vector<2x32x32xf32>
    %cst_9 = arith.constant dense<0.000000e+00> : vector<2x32x32xf32>
    %8 = tpu.matmul %5, %6, %cst_9 {dimension_numbers = #tpu.dot_dimension_numbers<[1], [1], [2], [2], [0, 0, 0, 2, 1, 2], [0], [0]>} : vector<2x8x32xf32>, vector<2x8x32xf32>, vector<2x32x32xf32> -> vector<2x32x32xf32>
    %9 = arith.addf %7, %8 : vector<2x32x32xf32>
    %c0_10 = arith.constant 0 : index
    %c0_11 = arith.constant 0 : index
    %c0_12 = arith.constant 0 : index
    %10 = vector.load %arg6[%c0_10, %c0_11, %c0_12] : memref<2x32x32xf32, #tpu.memory_space<vmem>>, vector<2x32x32xf32>
    tpu.vector_store %arg6[%c0_10, %c0_11, %c0_12], %9 {strides = array<i32>} : memref<2x32x32xf32, #tpu.memory_space<vmem>>, vector<2x32x32xf32>,
    %c0_13 = arith.constant 0 : index
    %c0_14 = arith.constant 0 : index
    %c0_15 = arith.constant 0 : index
    %11 = vector.load %arg7[%c0_13, %c0_14, %c0_15] : memref<2x1x32xf32, #tpu.memory_space<vmem>>, vector<2x1x32xf32>
    %cst_16 = arith.constant dense<0.000000e+00> : vector<2x32xf32>
    %12 = vector.multi_reduction <add>, %5, %cst_16 [1] : vector<2x8x32xf32> to vector<2x32xf32>
    %13 = vector.shape_cast %12 : vector<2x32xf32> to vector<2x1x32xf32>
    %14 = arith.addf %11, %13 : vector<2x1x32xf32>
    %c0_17 = arith.constant 0 : index
    %c0_18 = arith.constant 0 : index
    %c0_19 = arith.constant 0 : index
    %15 = vector.load %arg7[%c0_17, %c0_18, %c0_19] : memref<2x1x32xf32, #tpu.memory_space<vmem>>, vector<2x1x32xf32>
    tpu.vector_store %arg7[%c0_17, %c0_18, %c0_19], %14 {strides = array<i32>} : memref<2x1x32xf32, #tpu.memory_space<vmem>>, vector<2x1x32xf32>,
    %c0_i32_20 = arith.constant 0 : i32
    %16 = arith.cmpi eq, %arg1, %c0_i32_20 : i32
    %17 = arith.extui %16 : i1 to i32
    %c0_i32_21 = arith.constant 0 : i32
    %18 = arith.cmpi ne, %17, %c0_i32_21 : i32
    scf.if %18 {
      %c0_22 = arith.constant 0 : index
      %c0_23 = arith.constant 0 : index
      %c0_24 = arith.constant 0 : index
      %19 = vector.load %arg6[%c0_22, %c0_23, %c0_24] : memref<2x32x32xf32, #tpu.memory_space<vmem>>, vector<2x32x32xf32>
      %c0_25 = arith.constant 0 : index
      %c0_26 = arith.constant 0 : index
      %c0_27 = arith.constant 0 : index
      %20 = vector.load %arg7[%c0_25, %c0_26, %c0_27] : memref<2x1x32xf32, #tpu.memory_space<vmem>>, vector<2x1x32xf32>
      %c0_28 = arith.constant 0 : index
      %c0_29 = arith.constant 0 : index
      %c0_30 = arith.constant 0 : index
      %21 = vector.load %arg2[%c0_28, %c0_29, %c0_30] : memref<2x8x32xf32, #tpu.memory_space<vmem>>, vector<2x8x32xf32>
      %cst_31 = arith.constant 0.000000e+00 : f32
      %22 = vector.broadcast %cst_31 : f32 to vector<2x8x32xf32>
      %23 = arith.maximumf %21, %22 : vector<2x8x32xf32>
      %cst_32 = arith.constant dense<0.000000e+00> : vector<2x8x32xf32>
      %24 = tpu.matmul %23, %19, %cst_32 {dimension_numbers = #tpu.dot_dimension_numbers<[2], [1], [1], [2], [0, 0, 0, 1, 1, 2], [0], [0]>} : vector<2x8x32xf32>, vector<2x32x32xf32>, vector<2x8x32xf32> -> vector<2x8x32xf32>
      %25 = vector.broadcast %20 : vector<2x1x32xf32> to vector<2x8x32xf32>
      %26 = arith.mulf %23, %25 : vector<2x8x32xf32>
      %cst_33 = arith.constant dense<0.000000e+00> : vector<2x8xf32>
      %27 = vector.multi_reduction <add>, %26, %cst_33 [2] : vector<2x8x32xf32> to vector<2x8xf32>
      %28 = vector.shape_cast %27 : vector<2x8xf32> to vector<2x8x1xf32>
      %cst_34 = arith.constant 9.99999974E-6 : f32
      %29 = vector.broadcast %cst_34 : f32 to vector<2x8x1xf32>
      %30 = arith.addf %28, %29 : vector<2x8x1xf32>
      %31 = tpu.reciprocal %30 {approx = true} : vector<2x8x1xf32> -> vector<2x8x1xf32>
      %32 = vector.broadcast %31 : vector<2x8x1xf32> to vector<2x8x32xf32>
      %33 = arith.mulf %24, %32 : vector<2x8x32xf32>
      %c0_35 = arith.constant 0 : index
      %c0_36 = arith.constant 0 : index
      %c0_37 = arith.constant 0 : index
      %34 = vector.load %arg5[%c0_35, %c0_36, %c0_37] : memref<2x8x32xf32, #tpu.memory_space<vmem>>, vector<2x8x32xf32>
      tpu.vector_store %arg5[%c0_35, %c0_36, %c0_37], %33 {strides = array<i32>} : memref<2x8x32xf32, #tpu.memory_space<vmem>>, vector<2x8x32xf32>,
    } else {
    }
    return
  }
  func.func @transform_0(%arg0: i32, %arg1: i32) -> (i32, i32, i32) {
    %c0_i32 = arith.constant 0 : i32
    %c0_i32_0 = arith.constant 0 : i32
    %c0_i32_1 = arith.constant 0 : i32
    return %arg0, %c0_i32, %c0_i32_0 : i32, i32, i32
  }
  func.func @transform_1(%arg0: i32, %arg1: i32) -> (i32, i32, i32) {
    %c0_i32 = arith.constant 0 : i32
    %c0_i32_0 = arith.constant 0 : i32
    return %arg0, %arg1, %c0_i32 : i32, i32, i32
  }
  func.func @transform_2(%arg0: i32, %arg1: i32) -> (i32, i32, i32) {
    %c0_i32 = arith.constant 0 : i32
    %c0_i32_0 = arith.constant 0 : i32
    return %arg0, %arg1, %c0_i32 : i32, i32, i32
  }
  func.func @transform_3(%arg0: i32, %arg1: i32) -> (i32, i32, i32) {
    %c0_i32 = arith.constant 0 : i32
    %c0_i32_0 = arith.constant 0 : i32
    %c0_i32_1 = arith.constant 0 : i32
    return %arg0, %c0_i32, %c0_i32_0 : i32, i32, i32
  }
}

</mosaic_0001>

<bundles_post_ra>
// kernel: tpu_custom_call.1
= control target key start
LH: loop header
LB: loop body
LE: loop exit
PB: predicated region body
PF: predicated region fallthrough
CT: control target
= control target key end

     0   :  { %8 = vsyncpa [#allocation5], 0  ;;  %s932_s0 = inlined_call_operand.hbm [shape: f32[2,8,32], index: 0, kind: input, shape index: {}]   ;;  %s933_s1 = inlined_call_operand.hbm [shape: f32[2,8,32], index: 1, kind: input, shape index: {}]   ;;  %s934_s2 = inlined_call_operand.hbm [shape: f32[2,8,32], index: 2, kind: input, shape index: {}]   ;;  %s935_s3 = inlined_call_operand.hbm [shape: f32[2,8,32], index: 3, kind: output, shape index: {}]  }
   0x1   :  { %9 = vsyncpa [#allocation8], 0 }
   0x2   :  { %10 = vsyncpa [#allocation6], 0  ;;  %s781_s12 = smov [#allocation7]   ;;  %s782_s14 = smov [#allocation4]  }
   0x3   :  { %s28_s13 = sshll.u32 %s781_s12, 4  ;;  %s16_s15 = sshll.u32 %s782_s14, 4  ;;  %s29_s13 = int_to_ptr.vmem [resolvable:$true] %s28_s13  ;;  %s810_s15 = int_to_ptr.vmem [resolvable:$true] %s16_s15 }
   0x4   :  { %s687_s18 = scalar_lea.hbm %s933_s1, 256 }
   0x5   :  { %p688_p0 = scmp.ne.s32.totalorder %s933_s1, %s687_s18  ;;  %p691_p1 = scmp.lt.u32.totalorder %s687_s18, %s933_s1 }
   0x7   :  { %p693_p2 = pnand %p691_p1, %p688_p0 }
   0x9   :  { %696 = shalt.err (!%p693_p2)
}
   0xa   :  { %s697_s23 = scalar_lea.vmem %s29_s13, 256  ;;  %p702_p4 = scmp.lt.s32.totalorder %s29_s13, %s29_s13 }
   0xb   :  { %p698_p3 = scmp.ne.s32.totalorder %s29_s13, %s697_s23  ;;  %p703_p5 = scmp.lt.s32.totalorder %s697_s23, %s697_s23 }
   0xd   :  { %p704_p6 = por %p703_p5, %p702_p4 }
   0xf   :  { %p705_p7 = pnand %p704_p6, %p698_p3 }
  0x11   :  { %708 = shalt.err (!%p705_p7)
}
  0x12   :  { %s783_s24 = smov 128   ;;  %s784_s25 = smov 8  }
  0x13   :  { %34 = dma.hbm_to_vmem [thread:$0]  %s933_s1, 256, %s29_s13, [#allocation8], %s783_s24, %s783_s24, %s784_s25  }
  0x14   :  { %s709_s30 = scalar_lea.hbm %s932_s0, 256 }
  0x15   :  { %p710_p8 = scmp.ne.s32.totalorder %s932_s0, %s709_s30  ;;  %p713_p9 = scmp.lt.u32.totalorder %s709_s30, %s932_s0 }
  0x17   :  { %p715_p10 = pnand %p713_p9, %p710_p8 }
  0x19   :  { %718 = shalt.err (!%p715_p10)
}
  0x1a   :  { %s719_s8 = scalar_lea.vmem %s810_s15, 256  ;;  %p724_p12 = scmp.lt.s32.totalorder %s810_s15, %s810_s15 }
  0x1b   :  { %p720_p11 = scmp.ne.s32.totalorder %s810_s15, %s719_s8  ;;  %p725_p13 = scmp.lt.s32.totalorder %s719_s8, %s719_s8 }
  0x1d   :  { %p726_p0 = por %p725_p13, %p724_p12 }
  0x1f   :  { %p727_p1 = pnand %p726_p0, %p720_p11 }
  0x21   :  { %730 = shalt.err (!%p727_p1)
}
  0x22   :  { %22 = dma.hbm_to_vmem [thread:$0]  %s932_s0, 256, %s810_s15, [#allocation5], %s783_s24, %s783_s24, %s784_s25  }
  0x23   :  { %s785_s10 = smov [#allocation9]   ;;  %s731_s14 = scalar_lea.hbm %s934_s2, 256 }
  0x24   :  { %s40_s11 = sshll.u32 %s785_s10, 4  ;;  %p732_p2 = scmp.ne.s32.totalorder %s934_s2, %s731_s14  ;;  %s41_s11 = int_to_ptr.vmem [resolvable:$true] %s40_s11 }
  0x25   :  { %p735_p3 = scmp.lt.u32.totalorder %s731_s14, %s934_s2 }
  0x27   :  { %p737_p4 = pnand %p735_p3, %p732_p2 }
  0x29   :  { %740 = shalt.err (!%p737_p4)
}
  0x2a   :  { %s741_s20 = scalar_lea.vmem %s41_s11, 256  ;;  %p746_p6 = scmp.lt.s32.totalorder %s41_s11, %s41_s11 }
  0x2b   :  { %p742_p5 = scmp.ne.s32.totalorder %s41_s11, %s741_s20  ;;  %p747_p7 = scmp.lt.s32.totalorder %s741_s20, %s741_s20 }
  0x2d   :  { %p748_p8 = por %p747_p7, %p746_p6 }
  0x2f   :  { %p749_p9 = pnand %p748_p8, %p742_p5 }
  0x31   :  { %752 = shalt.err (!%p749_p9)
}
  0x32   :  { %46 = dma.hbm_to_vmem [thread:$0]  %s934_s2, 256, %s41_s11, [#allocation8], %s783_s24, %s783_s24, %s784_s25  }
  0x33   :  { %775 = dma.done.wait [#allocation5], 256  }
  0x34   :  { %776 = vsyncadd [#allocation5], 4294967040 }
  0x35   :  { %777 = dma.done.wait [#allocation8], 512  }
  0x36   :  { %778 = vsyncadd [#allocation8], 4294966784  ;;  %vm60_vm0 = vcmask 261120   ;;  %vm69_vm1 = vcmask 253952   ;;  %v786_v0 = vmov 0.0   ;;  %v72_v1 = vld [vmem:[#allocation7] sm:$0xff] }
  0x37   :  { %70 = vst.msk [vmem:[#allocation3] sm:$0x1] %vm69_vm1, %v786_v0  ;;  %71 = vst.msk [vmem:[#allocation3 + $0x1] sm:$0x1] %vm69_vm1, %v786_v0  ;;  %v73_v2 = vld [vmem:[#allocation7 + $0x8] sm:$0xff]  ;;  %v74_v3 = vmax.f32 %v72_v1, 0.0 }
  0x38   :  { %61 = vst.msk [vmem:[#allocation2] sm:$0xff] %vm60_vm0, %v786_v0  ;;  %62 = vst.msk [vmem:[#allocation2 + $0x8] sm:$0xff] %vm60_vm0, %v786_v0  ;;  %v75_v4 = vmax.f32 %v73_v2, 0.0  ;;  %v76_v9 = vld [vmem:[#allocation9] sm:$0xff]  ;;  %v77_v24 = vld [vmem:[#allocation9 + $0x8] sm:$0xff]  ;;  %vm118_vm2 = vcmask 64512  }
  0x39   :  { %63 = vst.msk [vmem:[#allocation2 + $0x10] sm:$0xff] %vm60_vm0, %v786_v0  ;;  %64 = vst.msk [vmem:[#allocation2 + $0x18] sm:$0xff] %vm60_vm0, %v786_v0  ;;  %86 = vxpose.xlu0.b32.start.end [1/1] (short) (narrow) %v74_v3, 32  ;;  %v364_v5 = vsel %vm60_vm0, %v74_v3, 0.0  ;;  %624 = vmatprep.subr.mxu0 %v76_v9  ;;  %v787_v33 = vmov 0.0|0.0   ;;  %vm788_vm3 = vmmov 0  }
  0x3a   :  { %65 = vst.msk [vmem:[#allocation2 + $0x20] sm:$0xff] %vm60_vm0, %v786_v0  ;;  %66 = vst.msk [vmem:[#allocation2 + $0x28] sm:$0xff] %vm60_vm0, %v786_v0  ;;  %v371_v6 = vsel %vm60_vm0, %v75_v4, 0.0  ;;  %v365_v7 = vrot.slane %v364_v5, 4  ;;  %625 = vmatpush3.msra.mxu0 %v76_v9  ;;  %632 = vmatprep.subr.mxu1 %v77_v24  ;;  %v396_v34 = vld [vmem:[#allocation4] sm:$0xff]  ;;  %v898_v35 = vld [vmem:[#allocation4 + $0x8] sm:$0xff] }
  0x3b   :  { %67 = vst.msk [vmem:[#allocation2 + $0x30] sm:$0xff] %vm60_vm0, %v786_v0  ;;  %68 = vst.msk [vmem:[#allocation2 + $0x38] sm:$0xff] %vm60_vm0, %v786_v0  ;;  %v372_v8 = vrot.slane %v371_v6, 4  ;;  %633 = vmatpush3.msra.mxu1 %v77_v24  ;;  %662 = vmatprep.subr.bf16.mxu0 %v787_v33  ;;  %v398_v36 = vmax.f32 %v396_v34, 0.0  ;;  %v399_v37 = vmax.f32 %v898_v35, 0.0  ;;  %s789_s2 = smov [#allocation10]  }
  0x3c   :  { %v366_v10 = vadd.f32 %v365_v7, %v364_v5  ;;  %668 = vmatprep.subr.bf16.mxu1 %v787_v33  ;;  %s579_s21 = sshll.u32 %s789_s2, 4  ;;  %s580_s21 = int_to_ptr.vmem [resolvable:$true] %s579_s21 }
  0x3d   :  { %v373_v11 = vadd.f32 %v372_v8, %v371_v6  ;;  %s753_s22 = scalar_lea.vmem %s580_s21, 256  ;;  %p758_p11 = scmp.lt.s32.totalorder %s580_s21, %s580_s21 }
  0x3e   :  { %v367_v12 = vrot.slane %v366_v10, 2  ;;  %v362_v18 = vld [vmem:[#allocation3] sm:$0x1]  ;;  %v363_v19 = vld [vmem:[#allocation3 + $0x1] sm:$0x1]  ;;  %p754_p10 = scmp.ne.s32.totalorder %s580_s21, %s753_s22  ;;  %p759_p12 = scmp.lt.s32.totalorder %s753_s22, %s753_s22 }
  0x3f   :  { %v374_v13 = vrot.slane %v373_v11, 2  ;;  %v79_v44 = vld [vmem:[#allocation2 + $0x8] sm:$0xff]  ;;  %v78_v45 = vld [vmem:[#allocation2] sm:$0xff] }
  0x40   :  { %v368_v14 = vadd.f32 %v367_v12, %v366_v10  ;;  %v81_v50 = vld [vmem:[#allocation2 + $0x18] sm:$0xff]  ;;  %v80_v51 = vld [vmem:[#allocation2 + $0x10] sm:$0xff]  ;;  %p760_p13 = por %p759_p12, %p758_p11 }
  0x41   :  { %v375_v15 = vadd.f32 %v374_v13, %v373_v11  ;;  %v83_v59 = vld [vmem:[#allocation2 + $0x28] sm:$0xff]  ;;  %v82_v60 = vld [vmem:[#allocation2 + $0x20] sm:$0xff] }
  0x42   :  { %v369_v16 = vrot.slane %v368_v14, 1  ;;  %v84_v5 = vld [vmem:[#allocation2 + $0x30] sm:$0xff]  ;;  %p761_p0 = pnand %p760_p13, %p754_p10 }
  0x43   :  { %v376_v17 = vrot.slane %v375_v15, 1 }
  0x44   :  { %v370_v20 = vadd.f32 %v369_v16, %v368_v14 }
  0x45   :  { %v377_v21 = vadd.f32 %v376_v17, %v375_v15 }
  0x46   :  { %v378_v22 = vadd.f32 %v370_v20, %v362_v18  ;;  %216 = vxpose.xlu0.b32.start.end [1/1] (short) (narrow) %v75_v4, 32  ;;  %v85_v4 = vld [vmem:[#allocation2 + $0x38] sm:$0xff] }
  0x47   :  { %v379_v23 = vadd.f32 %v377_v21, %v363_v19 }
  0x48   :  { %381 = vst.msk [vmem:[#allocation3] sm:$0x1] %vm69_vm1, %v378_v22 }
  0x49   :  { %382 = vst.msk [vmem:[#allocation3 + $0x1] sm:$0x1] %vm69_vm1, %v379_v23 }
  0x4f   :  { %v602_v38 = vld [vmem:[#allocation3] ss:$0 sm:$0xff] }
  0x50   :  { %v603_v39 = vld [vmem:[#allocation3 + $0x1] ss:$0 sm:$0xff]  ;;  %v558_v40 = vmul.f32 %v602_v38, %v398_v36 }
  0x51   :  { %v559_v41 = vmul.f32 %v603_v39, %v399_v37 }
  0x52   :  { %v560_v42 = vsel %vm60_vm0, %v558_v40, 0.0 }
  0x53   :  { %561 = vadd.xlane.f32.xlu1 %v560_v42  ;;  %v563_v43 = vsel %vm60_vm0, %v559_v41, 0.0 }
  0x57   :  { %564 = vadd.xlane.f32.xlu1 %v563_v43 }
  0xb9   :  { %v102_v25 = vpop.trf.xlu0 }
  0xba   :  { %626 = vmatprep.mubr.msk.f32.mxu0 %vm118_vm2, %v102_v25 }
  0xbd   :  { %v103_v26 = vpop.trf.xlu0 }
  0xbe   :  { %627 = vmatmul.mubr.msk.f32.vlgmr.msra.gmra.mrb[0].mxu0 %vm118_vm2, %v103_v26 }
  0xc1   :  { %v104_v27 = vpop.trf.xlu0 }
  0xc2   :  { %629 = vmatprep.mubr.msk.f32.mxu0 %vm118_vm2, %v104_v27 }
  0xc5   :  { %v105_v28 = vpop.trf.xlu0 }
  0xc6   :  { %630 = vmatmul.mubr.msk.f32.gmra.mrb[2].mxu0 %vm118_vm2, %v105_v28 }
  0xc7   :  { %648 = vmatprep.mubr.msk.f32.mxu0 %vm788_vm3, %v786_v0 }
  0xc9   :  { %v232_v29 = vpop.trf.xlu0 }
  0xca   :  { %634 = vmatprep.mubr.msk.f32.mxu1 %vm118_vm2, %v232_v29 }
  0xcd   :  { %v233_v30 = vpop.trf.xlu0 }
  0xce   :  { %635 = vmatmul.mubr.msk.f32.vlgmr.msra.gmra.mrb[0].mxu1 %vm118_vm2, %v233_v30 }
  0xd1   :  { %v234_v31 = vpop.trf.xlu0 }
  0xd2   :  { %637 = vmatprep.mubr.msk.f32.mxu1 %vm118_vm2, %v234_v31 }
  0xd5   :  { %v235_v32 = vpop.trf.xlu0 }
  0xd6   :  { %638 = vmatmul.mubr.msk.f32.gmra.mrb[2].mxu1 %vm118_vm2, %v235_v32 }
  0xd7   :  { %659 = vmatprep.mubr.msk.f32.mxu1 %vm788_vm3, %v786_v0 }
  0xe0   :  { %v562_v16 = vpop.xlane.xlu1 %561 }
  0xe1   :  { %v566_v17 = vadd.f32 1e-05, %v562_v16 }
  0xe3   :  { %683 = vrcp.f32 %v566_v17 }
  0xe4   :  { %v565_v18 = vpop.xlane.xlu1 %564 }
  0xe5   :  { %v567_v20 = vadd.f32 1e-05, %v565_v18 }
  0xe7   :  { %685 = vrcp.f32 %v567_v20 }
  0xed   :  { %v684_v19 = vpop.eup %683 }
  0xf1   :  { %v686_v24 = vpop.eup %685 }
 0x191   :  { %v628_v46 = vpop.f32.mrb[0].mxu0 }
 0x192   :  { %v346_v47 = vadd.f32 %v628_v46, %v79_v44  ;;  %v197_v48 = vpop.f32.mrb[1].mxu0 }
 0x193   :  { %v345_v49 = vadd.f32 %v197_v48, %v78_v45 }
 0x194   :  { %355 = vst.msk [vmem:[#allocation2 + $0x8] sm:$0xff] %vm60_vm0, %v346_v47 }
 0x195   :  { %354 = vst.msk [vmem:[#allocation2] sm:$0xff] %vm60_vm0, %v345_v49 }
 0x199   :  { %v631_v52 = vpop.f32.mrb[2].mxu0 }
 0x19a   :  { %v348_v53 = vadd.f32 %v631_v52, %v81_v50  ;;  %v207_v54 = vpop.f32.mrb[3].mxu0 }
 0x19b   :  { %v347_v55 = vadd.f32 %v207_v54, %v80_v51  ;;  %v387_v56 = vld [vmem:[#allocation2 + $0x8] sm:$0xff] }
 0x19c   :  { %357 = vst.msk [vmem:[#allocation2 + $0x18] sm:$0xff] %vm60_vm0, %v348_v53  ;;  %v386_v57 = vld [vmem:[#allocation2] sm:$0xff] }
 0x19d   :  { %356 = vst.msk [vmem:[#allocation2 + $0x10] sm:$0xff] %vm60_vm0, %v347_v55  ;;  %v663_v58 = vpack.c.bf16 %v387_v56, %v386_v57 }
 0x19f   :  { %664 = vmatpush3.bf16.msra.mxu0 %v663_v58 }
 0x1a0   :  { %665 = vmatprep.subr.bf16.mxu0 %v787_v33 }
 0x1a1   :  { %v636_v61 = vpop.f32.mrb[0].mxu1 }
 0x1a2   :  { %v350_v62 = vadd.f32 %v636_v61, %v83_v59  ;;  %v326_v63 = vpop.f32.mrb[1].mxu1 }
 0x1a3   :  { %v349_v0 = vadd.f32 %v326_v63, %v82_v60  ;;  %v389_v1 = vld [vmem:[#allocation2 + $0x18] sm:$0xff] }
 0x1a4   :  { %359 = vst.msk [vmem:[#allocation2 + $0x28] sm:$0xff] %vm60_vm0, %v350_v62  ;;  %v388_v2 = vld [vmem:[#allocation2 + $0x10] sm:$0xff] }
 0x1a5   :  { %358 = vst.msk [vmem:[#allocation2 + $0x20] sm:$0xff] %vm60_vm0, %v349_v0  ;;  %v666_v3 = vpack.c.bf16 %v389_v1, %v388_v2 }
 0x1a7   :  { %667 = vmatpush3.bf16.msra.mxu0 %v666_v3 }
 0x1a9   :  { %v639_v6 = vpop.f32.mrb[2].mxu1 }
 0x1aa   :  { %v352_v7 = vadd.f32 %v639_v6, %v85_v4  ;;  %v336_v8 = vpop.f32.mrb[3].mxu1  ;;  %649 = vmatmul.mubr.msk.f32.vlgmr.msra.gmra.mrb[4].mxu0 %vm60_vm0, %v398_v36 }
 0x1ab   :  { %v351_v9 = vadd.f32 %v336_v8, %v84_v5  ;;  %v391_v10 = vld [vmem:[#allocation2 + $0x28] sm:$0xff] }
 0x1ac   :  { %361 = vst.msk [vmem:[#allocation2 + $0x38] sm:$0xff] %vm60_vm0, %v352_v7  ;;  %v390_v11 = vld [vmem:[#allocation2 + $0x20] sm:$0xff] }
 0x1ad   :  { %360 = vst.msk [vmem:[#allocation2 + $0x30] sm:$0xff] %vm60_vm0, %v351_v9  ;;  %v669_v12 = vpack.c.bf16 %v391_v10, %v390_v11 }
 0x1af   :  { %670 = vmatpush3.bf16.msra.mxu1 %v669_v12 }
 0x1b0   :  { %671 = vmatprep.subr.bf16.mxu1 %v787_v33 }
 0x1b3   :  { %v393_v13 = vld [vmem:[#allocation2 + $0x38] sm:$0xff] }
 0x1b4   :  { %v392_v14 = vld [vmem:[#allocation2 + $0x30] sm:$0xff] }
 0x1b5   :  { %v672_v15 = vpack.c.bf16 %v393_v13, %v392_v14 }
 0x1b7   :  { %673 = vmatpush3.bf16.msra.mxu1 %v672_v15 }
 0x1ba   :  { %660 = vmatmul.mubr.msk.f32.vlgmr.msra.gmra.mrb[4].mxu1 %vm60_vm0, %v399_v37 }
 0x27d   :  { %v469_v21 = vpop.f32.mrb[4].mxu0 }
 0x27e   :  { %v570_v22 = vmul.f32 %v684_v19, %v469_v21  ;;  %v650_v23 = vpop.f32.mrb[5].mxu0 }
 0x280   :  { %572 = vst.msk [vmem:[#allocation10] sm:$0xff] %vm60_vm0, %v570_v22 }
 0x28d   :  { %v542_v25 = vpop.f32.mrb[4].mxu1 }
 0x28e   :  { %v571_v26 = vmul.f32 %v686_v24, %v542_v25  ;;  %v661_v27 = vpop.f32.mrb[5].mxu1 }
 0x290   :  { %573 = vst.msk [vmem:[#allocation10 + $0x8] sm:$0xff] %vm60_vm0, %v571_v26 }
 0x291   :  { %764 = shalt.err (!%p761_p0)
}
 0x292   :  { %s765_s27 = scalar_lea.hbm %s935_s3, 256 }
 0x293   :  { %p766_p1 = scmp.ne.s32.totalorder %s935_s3, %s765_s27  ;;  %p769_p2 = scmp.lt.u32.totalorder %s765_s27, %s935_s3 }
 0x295   :  { %p771_p3 = pnand %p769_p2, %p766_p1 }
 0x297   :  { %774 = shalt.err (!%p771_p3)
}
 0x298   :  { %585 = dma.vmem_to_hbm [thread:$0]  %s580_s21, 256, %s935_s3, [#allocation6], %s783_s24, %s783_s24, %s784_s25  }
 0x299   :  { %779 = dma.done.wait [#allocation6], 256  }
 0x29a   :  { %780 = vsyncadd [#allocation6], 4294967040 }
 0x29b   :  { %589 = vsyncpa [#allocation5], 1 }
 0x29c   :  { %590 = vsyncpa [#allocation8], 1 }
 0x29d   :  { %591 = vsyncpa [#allocation6], 1 }

</bundles_post_ra>
